<compile_context>
chip_gen: v6e
topology: v6e:2x2x1
jax: 0.10.0
libtpu: 0.0.40
codegen_flags: <defaults>
</compile_context>

<pallas_src>
import numpy as np

import jax
import jax.numpy as jnp
from jax import lax
from jax.experimental import pallas as pl
from jax.experimental.pallas import tpu as pltpu

SLAB_COLS = 128  # lane-padded parameter-slab width (review: "(K, 128)-padded")


def _round_up8(x):
    return (x + 7) // 8 * 8


def naive_nn_kernel(z_ref, p_ref, out_ref):
    # Shapes are static; derive layer sizes from the refs themselves.
    n_in = z_ref.shape[0]    # torch N  (Linear(N, N) input features)
    n_out = out_ref.shape[0]  # torch n  (Linear(N, n) / Linear(n, n) features)

    # 8-aligned row offsets of the three [W | b] blocks inside the slab
    # (must match pack_params below).
    r1 = 0
    r2 = _round_up8(n_in)
    r3 = r2 + _round_up8(n_out)

    z = z_ref[...]                                   # (N, P)

    # Static slices of the packed slab: zero-cost Ref views, single VMEM load.
    w1 = p_ref[r1:r1 + n_in, 0:n_in]                 # (N, N)
    b1 = p_ref[r1:r1 + n_in, n_in:n_in + 1]          # (N, 1)
    w2 = p_ref[r2:r2 + n_out, 0:n_in]                # (n, N)
    b2 = p_ref[r2:r2 + n_out, n_in:n_in + 1]         # (n, 1)
    w3 = p_ref[r3:r3 + n_out, 0:n_out]               # (n, n)
    b3 = p_ref[r3:r3 + n_out, n_out:n_out + 1]       # (n, 1)

    # Sequential(Linear, Linear, ReLU, Linear, ReLU): NO activation after the
    # first Linear (faithful to the torch module).
    h1 = jnp.dot(w1, z, preferred_element_type=jnp.float32) + b1          # (N, P)
    h2 = jnp.maximum(jnp.dot(w2, h1, preferred_element_type=jnp.float32) + b2, 0.0)  # (n, P)
    h3 = jnp.maximum(jnp.dot(w3, h2, preferred_element_type=jnp.float32) + b3, 0.0)  # (n, P)

    out_ref[...] = h3.astype(out_ref.dtype)


def init_params(key, n_in, n_out):
    # Deterministic synthetic init matching torch nn.Linear shapes/ranges:
    #   Linear(N, N), Linear(N, n), Linear(n, n)
    ks = jax.random.split(key, 6)

    def lin(kw, kb, fan_out, fan_in):
        bound = 1.0 / np.sqrt(fan_in)
        W = jax.random.uniform(kw, (fan_out, fan_in), jnp.float32, -bound, bound)
        b = jax.random.uniform(kb, (fan_out,), jnp.float32, -bound, bound)
        return W, b

    W1, b1 = lin(ks[0], ks[1], n_in, n_in)
    W2, b2 = lin(ks[2], ks[3], n_out, n_in)
    W3, b3 = lin(ks[4], ks[5], n_out, n_out)
    return dict(W1=W1, b1=b1, W2=W2, b2=b2, W3=W3, b3=b3)


def pack_params(params, n_in, n_out, cols=SLAB_COLS):
    """Pack all layer params into one (R, cols) fp32 slab.

    Block i occupies 8-aligned rows; columns [0:K] hold W_i, column [K] holds
    b_i (already a column vector in-kernel).  Packed once, reused every call.
    """
    assert cols >= max(n_in, n_out) + 1
    r2 = _round_up8(n_in)
    r3 = r2 + _round_up8(n_out)
    rows = r3 + _round_up8(n_out)

    slab = jnp.zeros((rows, cols), jnp.float32)
    slab = slab.at[0:n_in, 0:n_in].set(params["W1"])
    slab = slab.at[0:n_in, n_in].set(params["b1"])
    slab = slab.at[r2:r2 + n_out, 0:n_in].set(params["W2"])
    slab = slab.at[r2:r2 + n_out, n_in].set(params["b2"])
    slab = slab.at[r3:r3 + n_out, 0:n_out].set(params["W3"])
    slab = slab.at[r3:r3 + n_out, n_out].set(params["b3"])
    return slab


def naive_nn_forward(z0, param_slab, n_out):
    n_in, p = z0.shape
    vmem = pl.BlockSpec(memory_space=pltpu.MemorySpace.VMEM)
    return pl.pallas_call(
        naive_nn_kernel,
        out_shape=jax.ShapeDtypeStruct((n_out, p), jnp.float32),
        in_specs=[vmem, vmem],
        out_specs=vmem,
    )(z0, param_slab)


def reference_forward(z0, params):
    # Pure-JAX mirror of the torch module (for correctness checking).
    hp = lax.Precision.HIGHEST
    x = z0.T                                                   # (P, N)
    h = jnp.dot(x, params["W1"].T, precision=hp) + params["b1"]
    h = jnp.dot(h, params["W2"].T, precision=hp) + params["b2"]
    h = jax.nn.relu(h)
    h = jnp.dot(h, params["W3"].T, precision=hp) + params["b3"]
    h = jax.nn.relu(h)
    return h.T                                                 # (n, P)


if __name__ == "__main__":
    N_IN, N_OUT, P = 12, 8, 128   # NaiveNN(N=12, n=8), 128 path points

    key = jax.random.PRNGKey(0)
    kz, kp = jax.random.split(key)
    z0 = jax.random.normal(kz, (N_IN, P), jnp.float32)
    params = init_params(kp, N_IN, N_OUT)

    # Pack once (amortized across repeated forward evaluations).
    slab = pack_params(params, N_IN, N_OUT)

    out = naive_nn_forward(z0, slab, N_OUT)
    out = jax.block_until_ready(out)

    ref = reference_forward(z0, params)
    np.testing.assert_allclose(np.asarray(out), np.asarray(ref), rtol=2e-3, atol=2e-3)
    print("KERNEL_OK")
</pallas_src>

<mosaic_0001>
module attributes {stable_mosaic.version = 11 : i64} {
  func.func @naive_nn_kernel(%arg0: memref<12x128xf32, #tpu.memory_space<vmem>>, %arg1: memref<32x128xf32, #tpu.memory_space<vmem>>, %arg2: memref<8x128xf32, #tpu.memory_space<vmem>>) attributes {dimension_semantics = [], scalar_prefetch = 0 : i64, scratch_operands = 0 : i64, tpu.core_type = #tpu.core_type<tc>} {
    %c0 = arith.constant 0 : index
    %c0_0 = arith.constant 0 : index
    %0 = vector.load %arg0[%c0, %c0_0] : memref<12x128xf32, #tpu.memory_space<vmem>>, vector<12x128xf32>
    %c0_1 = arith.constant 0 : index
    %c0_2 = arith.constant 0 : index
    %1 = vector.load %arg1[%c0_1, %c0_2] : memref<32x128xf32, #tpu.memory_space<vmem>>, vector<12x12xf32>
    %c0_3 = arith.constant 0 : index
    %c12 = arith.constant 12 : index
    %2 = vector.load %arg1[%c0_3, %c12] : memref<32x128xf32, #tpu.memory_space<vmem>>, vector<12x1xf32>
    %c16 = arith.constant 16 : index
    %c0_4 = arith.constant 0 : index
    %3 = vector.load %arg1[%c16, %c0_4] : memref<32x128xf32, #tpu.memory_space<vmem>>, vector<8x12xf32>
    %c16_5 = arith.constant 16 : index
    %c12_6 = arith.constant 12 : index
    %4 = vector.load %arg1[%c16_5, %c12_6] : memref<32x128xf32, #tpu.memory_space<vmem>>, vector<8x1xf32>
    %c24 = arith.constant 24 : index
    %c0_7 = arith.constant 0 : index
    %5 = vector.load %arg1[%c24, %c0_7] : memref<32x128xf32, #tpu.memory_space<vmem>>, vector<8x8xf32>
    %c24_8 = arith.constant 24 : index
    %c8 = arith.constant 8 : index
    %6 = vector.load %arg1[%c24_8, %c8] : memref<32x128xf32, #tpu.memory_space<vmem>>, vector<8x1xf32>
    %cst = arith.constant dense<0.000000e+00> : vector<12x128xf32>
    %7 = tpu.matmul %1, %0, %cst {dimension_numbers = #tpu.dot_dimension_numbers<[1], [0], [0], [1], [0, 0, 1, 1], [], []>} : vector<12x12xf32>, vector<12x128xf32>, vector<12x128xf32> -> vector<12x128xf32>
    %8 = vector.broadcast %2 : vector<12x1xf32> to vector<12x128xf32>
    %9 = arith.addf %7, %8 : vector<12x128xf32>
    %cst_9 = arith.constant dense<0.000000e+00> : vector<8x128xf32>
    %10 = tpu.matmul %3, %9, %cst_9 {dimension_numbers = #tpu.dot_dimension_numbers<[1], [0], [0], [1], [0, 0, 1, 1], [], []>} : vector<8x12xf32>, vector<12x128xf32>, vector<8x128xf32> -> vector<8x128xf32>
    %11 = vector.broadcast %4 : vector<8x1xf32> to vector<8x128xf32>
    %12 = arith.addf %10, %11 : vector<8x128xf32>
    %cst_10 = arith.constant 0.000000e+00 : f32
    %13 = vector.broadcast %cst_10 : f32 to vector<8x128xf32>
    %14 = arith.maximumf %12, %13 : vector<8x128xf32>
    %cst_11 = arith.constant dense<0.000000e+00> : vector<8x128xf32>
    %15 = tpu.matmul %5, %14, %cst_11 {dimension_numbers = #tpu.dot_dimension_numbers<[1], [0], [0], [1], [0, 0, 1, 1], [], []>} : vector<8x8xf32>, vector<8x128xf32>, vector<8x128xf32> -> vector<8x128xf32>
    %16 = vector.broadcast %6 : vector<8x1xf32> to vector<8x128xf32>
    %17 = arith.addf %15, %16 : vector<8x128xf32>
    %cst_12 = arith.constant 0.000000e+00 : f32
    %18 = vector.broadcast %cst_12 : f32 to vector<8x128xf32>
    %19 = arith.maximumf %17, %18 : vector<8x128xf32>
    %c0_13 = arith.constant 0 : index
    %c0_14 = arith.constant 0 : index
    %20 = vector.load %arg2[%c0_13, %c0_14] : memref<8x128xf32, #tpu.memory_space<vmem>>, vector<8x128xf32>
    tpu.vector_store %arg2[%c0_13, %c0_14], %19 {strides = array<i32>} : memref<8x128xf32, #tpu.memory_space<vmem>>, vector<8x128xf32>,
    return
  }
}

</mosaic_0001>

<bundles_post_ra>
// kernel: tpu_custom_call.1
= control target key start
LH: loop header
LB: loop body
LE: loop exit
PB: predicated region body
PF: predicated region fallthrough
CT: control target
= control target key end

     0   :  { %7 = vsyncpa [#allocation3], 0  ;;  %s469_s0 = inlined_call_operand.hbm [shape: f32[12,128], index: 0, kind: input, shape index: {}]   ;;  %s470_s1 = inlined_call_operand.hbm [shape: f32[32,128], index: 1, kind: input, shape index: {}]   ;;  %s471_s2 = inlined_call_operand.hbm [shape: f32[8,128], index: 2, kind: output, shape index: {}]  }
   0x1   :  { %8 = vsyncpa [#allocation6], 0 }
   0x2   :  { %9 = vsyncpa [#allocation4], 0  ;;  %s430_s9 = smov [#allocation2]  }
   0x3   :  { %s15_s10 = sshll.u32 %s430_s9, 4  ;;  %s16_s10 = int_to_ptr.vmem [resolvable:$true] %s15_s10 }
   0x4   :  { %s372_s11 = scalar_lea.vmem %s16_s10, 256  ;;  %p377_p1 = scmp.lt.s32.totalorder %s16_s10, %s16_s10 }
   0x5   :  { %p373_p0 = scmp.ne.s32.totalorder %s16_s10, %s372_s11  ;;  %p378_p2 = scmp.lt.s32.totalorder %s372_s11, %s372_s11 }
   0x7   :  { %p379_p3 = por %p378_p2, %p377_p1 }
   0x9   :  { %p380_p4 = pnand %p379_p3, %p373_p0 }
   0xb   :  { %383 = shalt.err (!%p380_p4)
}
   0xc   :  { %s431_s12 = smov 128   ;;  %s432_s13 = smov 8  }
   0xd   :  { %21 = dma.hbm_to_vmem [thread:$0]  %s469_s0, 256, %s16_s10, [#allocation3], %s431_s12, %s431_s12, %s432_s13  }
   0xe   :  { %s433_s16 = smov [#allocation5]  }
   0xf   :  { %s27_s17 = sshll.u32 %s433_s16, 4  ;;  %s28_s17 = int_to_ptr.vmem [resolvable:$true] %s27_s17 }
  0x10   :  { %s392_s18 = scalar_lea.vmem %s28_s17, 512  ;;  %p397_p6 = scmp.lt.s32.totalorder %s28_s17, %s28_s17 }
  0x11   :  { %p393_p5 = scmp.ne.s32.totalorder %s28_s17, %s392_s18  ;;  %p398_p7 = scmp.lt.s32.totalorder %s392_s18, %s392_s18 }
  0x13   :  { %p399_p8 = por %p398_p7, %p397_p6 }
  0x15   :  { %p400_p9 = pnand %p399_p8, %p393_p5 }
  0x17   :  { %403 = shalt.err (!%p400_p9)
}
  0x18   :  { %33 = dma.hbm_to_vmem [thread:$0]  %s470_s1, 512, %s28_s17, [#allocation6], %s431_s12, %s431_s12, %s432_s13  }
  0x19   :  { %424 = dma.done.wait [#allocation3], 256  }
  0x1a   :  { %425 = vsyncadd [#allocation3], 4294967040 }
  0x1b   :  { %426 = dma.done.wait [#allocation6], 512  }
  0x1c   :  { %427 = vsyncadd [#allocation6], 4294966784  ;;  %v434_v0 = vmov 12   ;;  %vm61_vm0 = vcmask 1043456   ;;  %vm56_vm1 = vcmask 97280   ;;  %v40_v2 = vld [vmem:[#allocation2] sm:$0xff] }
  0x1d   :  { %360 = vset.pattern.permute.xlu0 %v434_v0  ;;  %361 = vset.pattern.permute.xlu1 %v434_v0  ;;  %v41_v1 = vld [vmem:[#allocation2 + $0x8] sm:$0xf]  ;;  %v42_v3 = vld [vmem:[#allocation5] sm:$0xff]  ;;  %v43_v4 = vld [vmem:[#allocation5 + $0x8] sm:$0xf]  ;;  %v435_v5 = vmov 0.0  }
  0x1e   :  { %332 = vmatprep.subr.msk.mxu0 %vm61_vm0, %v41_v1  ;;  %336 = vmatprep.mubr.msk.f32.mxu0 %vm56_vm1, %v42_v3  ;;  %vm436_vm2 = vmmov 0   ;;  %v44_v6 = vld [vmem:[#allocation5 + $0x10] sm:$0xff]  ;;  %v45_v13 = vld [vmem:[#allocation5 + $0x18] sm:$0xff]  ;;  %v437_v14 = vmov 8   ;;  %vm226_vm3 = vcmask 64512   ;;  %s438_s0 = smov [#allocation7]  }
  0x1f   :  { %333 = vmatpush3.msk.msra.mxu0 %vm61_vm0, %v41_v1  ;;  %53 = vperm.xlu0 %360, %v43_v4   ;;  %s307_s1 = sshll.u32 %s438_s0, 4  ;;  %s308_s1 = int_to_ptr.vmem [resolvable:$true] %s307_s1 }
  0x20   :  { %334 = vmatprep.subr.mxu0 %v40_v2  ;;  %339 = vmatprep.subr.mxu1 %v435_v5  ;;  %s404_s21 = scalar_lea.vmem %s308_s1, 128  ;;  %p409_p11 = scmp.lt.s32.totalorder %s308_s1, %s308_s1 }
  0x21   :  { %335 = vmatpush3.msra.mxu0 %v40_v2  ;;  %343 = vmatprep.mubr.msk.f32.mxu1 %vm436_vm2, %v435_v5  ;;  %p405_p10 = scmp.ne.s32.totalorder %s308_s1, %s404_s21  ;;  %p410_p12 = scmp.lt.s32.totalorder %s404_s21, %s404_s21 }
  0x22   :  { %337 = vmatmul.mubr.msk.f32.vlgmr.msra.gmra.mxu0 %vm56_vm1, %v43_v4  ;;  %346 = vmatprep.subr.mxu0 %v435_v5 }
  0x23   :  { %48 = vperm.xlu0 %360, %v42_v3   ;;  %348 = vmatprep.mubr.msk.f32.mxu0 %vm436_vm2, %v435_v5  ;;  %p411_p13 = por %p410_p12, %p409_p11 }
  0x24   :  { %142 = vperm.xlu1 %361, %v44_v6  }
  0x25   :  { %p412_p0 = pnand %p411_p13, %p405_p10 }
  0x27   :  { %363 = vset.pattern.permute.xlu0 %v437_v14 }
  0x28   :  { %362 = vset.pattern.permute.xlu1 %v437_v14 }
  0x29   :  { %223 = vperm.xlu1 %362, %v45_v13  }
  0x9a   :  { %v54_v7 = vpop.permute.xlu0 %53 }
  0x9e   :  { %v49_v10 = vpop.permute.xlu0 %48 }
  0x9f   :  { %v143_v15 = vpop.permute.xlu1 %142 }
  0xa4   :  { %v224_v20 = vpop.permute.xlu1 %223 }
  0xe2   :  { %v338_v8 = vpop.f32.mrf.mxu0 }
  0xe3   :  { %v137_v9 = vadd.f32 %v338_v8, %v54_v7 }
  0xe4   :  { %v131_v11 = vpop.f32.mrf.mxu0 }
  0xe5   :  { %v132_v12 = vadd.f32 %v131_v11, %v49_v10  ;;  %340 = vmatpush3.msk.msra.mxu1 %vm61_vm0, %v137_v9 }
  0xe6   :  { %341 = vmatprep.subr.mxu1 %v435_v5 }
  0xe7   :  { %342 = vmatpush3.msra.mxu1 %v132_v12 }
  0xe8   :  { %344 = vmatmul.mubr.msk.f32.vlgmr.msra.gmra.mxu1 %vm56_vm1, %v44_v6 }
 0x1a8   :  { %v216_v16 = vpop.f32.mrf.mxu1 }
 0x1a9   :  { %v217_v17 = vadd.f32 %v216_v16, %v143_v15 }
 0x1aa   :  { %v345_v18 = vpop.f32.mrf.mxu1 }
 0x1ab   :  { %v220_v19 = vmax.f32 %v217_v17, 0.0 }
 0x1ad   :  { %347 = vmatpush3.msra.mxu0 %v220_v19 }
 0x1ae   :  { %349 = vmatmul.mubr.msk.f32.vlgmr.msra.gmra.mxu0 %vm226_vm3, %v45_v13 }
 0x26e   :  { %v295_v21 = vpop.f32.mrf.mxu0 }
 0x26f   :  { %v296_v22 = vadd.f32 %v295_v21, %v224_v20 }
 0x270   :  { %v350_v23 = vpop.f32.mrf.mxu0 }
 0x271   :  { %v299_v24 = vmax.f32 %v296_v22, 0.0 }
 0x273   :  { %300 = vst [vmem:[#allocation7] sm:$0xff] %v299_v24 }
 0x274   :  { %415 = shalt.err (!%p412_p0)
}
 0x275   :  { %310 = dma.vmem_to_hbm [thread:$0]  %s308_s1, 128, %s471_s2, [#allocation4]  }
 0x276   :  { %428 = dma.done.wait [#allocation4], 128  }
 0x277   :  { %429 = vsyncadd [#allocation4], 4294967168 }
 0x278   :  { %314 = vsyncpa [#allocation3], 1 }
 0x279   :  { %315 = vsyncpa [#allocation6], 1 }
 0x27a   :  { %316 = vsyncpa [#allocation4], 1 }

</bundles_post_ra>
